<compile_context>
chip_gen: v6e
topology: v6e:2x2x1
jax: 0.10.0
libtpu: 0.0.40
codegen_flags: <defaults>
</compile_context>

<pallas_src>
import jax
import jax.numpy as jnp
from jax.experimental import pallas as pl
from jax.experimental.pallas import tpu as pltpu


def _round_up(a, b):
    return ((a + b - 1) // b) * b


def drrnn_kernel(x_ref, w_in_ref, b_in_ref, w1s_ref, b1s_ref, w2s_ref, b2s_ref,
                 w_out_ref, b_out_ref, o_ref):
    """Feature-major fused forward. Per grid step:
       x_ref    : (in_p, tile)        activations in  (features x batch-tile)
       w_in_ref : (m_p, in_p)         b_in_ref : (m_p, 1)
       w1s_ref  : (depth, m_p, m_p)   b1s_ref  : (depth, m_p, 1)
       w2s_ref  : (depth, m_p, m_p)   b2s_ref  : (depth, m_p, 1)
       w_out_ref: (out_p, m_p)        b_out_ref: (out_p, 1)
       o_ref    : (out_p, tile)       lane-dense output slab
    """
    f32 = jnp.float32
    x = x_ref[...].astype(f32)

    # stack[0]: input Linear (no activation in the PyTorch model)
    a = jnp.dot(w_in_ref[...].astype(f32), x, preferred_element_type=f32)
    a = a + b_in_ref[...].astype(f32)

    # `depth` residual Blocks, statically unrolled; activation never leaves VMEM.
    depth = w1s_ref.shape[0]
    for l in range(depth):
        h = jnp.tanh(
            jnp.dot(w1s_ref[l].astype(f32), a, preferred_element_type=f32)
            + b1s_ref[l].astype(f32))
        y = jnp.tanh(
            jnp.dot(w2s_ref[l].astype(f32), h, preferred_element_type=f32)
            + b2s_ref[l].astype(f32))
        a = y + a

    # stack[-1]: output Linear
    out = jnp.dot(w_out_ref[...].astype(f32), a, preferred_element_type=f32)
    out = out + b_out_ref[...].astype(f32)
    o_ref[...] = out.astype(o_ref.dtype)


def drrnn_forward(x, w_in, b_in, w1s, b1s, w2s, b2s, w_out, b_out, *,
                  tile_m=1024):
    """Full drrnn forward.

    x     : (N, in_N)                         row-major batch of points
    w_in  : (m, in_N)       b_in : (m, 1)     (PyTorch Linear layout)
    w1s   : (depth, m, m)   b1s  : (depth, m, 1)
    w2s   : (depth, m, m)   b2s  : (depth, m, 1)
    w_out : (out_N, m)      b_out: (out_N, 1)
    returns (N, out_N)
    """
    N, in_N = x.shape
    m = w_in.shape[0]
    out_N = w_out.shape[0]
    depth = w1s.shape[0]

    # --- layout plumbing: pad feature dims to sublane multiples (8) and pick a
    #     lane-dense batch tile (multiple of 128). Zero padding is inert.
    in_p = _round_up(in_N, 8)
    m_p = _round_up(m, 8)
    out_p = _round_up(out_N, 8)

    tile = max(128, (min(tile_m, _round_up(N, 128)) // 128) * 128)
    n_pad = _round_up(N, tile)
    grid = (n_pad // tile,)

    dt = x.dtype
    xt = jnp.zeros((in_p, n_pad), dt).at[:in_N, :N].set(x.T)
    w_in_p = jnp.zeros((m_p, in_p), w_in.dtype).at[:m, :in_N].set(w_in)
    b_in_p = jnp.zeros((m_p, 1), b_in.dtype).at[:m, :].set(b_in)
    w1s_p = jnp.zeros((depth, m_p, m_p), w1s.dtype).at[:, :m, :m].set(w1s)
    b1s_p = jnp.zeros((depth, m_p, 1), b1s.dtype).at[:, :m, :].set(b1s)
    w2s_p = jnp.zeros((depth, m_p, m_p), w2s.dtype).at[:, :m, :m].set(w2s)
    b2s_p = jnp.zeros((depth, m_p, 1), b2s.dtype).at[:, :m, :].set(b2s)
    w_out_p = jnp.zeros((out_p, m_p), w_out.dtype).at[:out_N, :m].set(w_out)
    b_out_p = jnp.zeros((out_p, 1), b_out.dtype).at[:out_N, :].set(b_out)

    const2 = lambda i: (0, 0)
    const3 = lambda i: (0, 0, 0)

    out_t = pl.pallas_call(
        drrnn_kernel,
        out_shape=jax.ShapeDtypeStruct((out_p, n_pad), dt),
        grid_spec=pl.GridSpec(
            grid=grid,
            in_specs=[
                pl.BlockSpec((in_p, tile), lambda i: (0, i)),   # x tile
                pl.BlockSpec((m_p, in_p), const2),              # W_in
                pl.BlockSpec((m_p, 1), const2),                 # b_in
                pl.BlockSpec((depth, m_p, m_p), const3),        # W1 stack
                pl.BlockSpec((depth, m_p, 1), const3),          # b1 stack
                pl.BlockSpec((depth, m_p, m_p), const3),        # W2 stack
                pl.BlockSpec((depth, m_p, 1), const3),          # b2 stack
                pl.BlockSpec((out_p, m_p), const2),             # W_out
                pl.BlockSpec((out_p, 1), const2),               # b_out
            ],
            out_specs=pl.BlockSpec((out_p, tile), lambda i: (0, i)),
        ),
        compiler_params=pltpu.CompilerParams(
            dimension_semantics=("parallel",),   # batch tiles shard across TCs
        ),
    )(xt, w_in_p, b_in_p, w1s_p, b1s_p, w2s_p, b2s_p, w_out_p, b_out_p)

    return out_t[:out_N, :N].T


def _init_linear(key, fan_in, fan_out):
    """torch.nn.Linear-style init: W (out, in), b (out, 1), U(+-1/sqrt(fan_in))."""
    kw, kb = jax.random.split(key)
    bound = 1.0 / jnp.sqrt(fan_in)
    w = jax.random.uniform(kw, (fan_out, fan_in), jnp.float32, -bound, bound)
    b = jax.random.uniform(kb, (fan_out, 1), jnp.float32, -bound, bound)
    return w, b


if __name__ == "__main__":
    # drrnn(in_N=2, m=32, out_N=1, depth=4) on a small batch of 512 points.
    in_N, m, out_N, depth = 2, 32, 1, 4
    N = 512

    key = jax.random.PRNGKey(0)
    kx, k_in, k_out, *k_blocks = jax.random.split(key, 3 + depth)

    x = jax.random.normal(kx, (N, in_N), jnp.float32)
    w_in, b_in = _init_linear(k_in, in_N, m)
    w_out, b_out = _init_linear(k_out, m, out_N)

    w1l, b1l, w2l, b2l = [], [], [], []
    for kb in k_blocks:
        k1, k2 = jax.random.split(kb)
        w1, b1 = _init_linear(k1, m, m)
        w2, b2 = _init_linear(k2, m, m)
        w1l.append(w1); b1l.append(b1); w2l.append(w2); b2l.append(b2)
    w1s, b1s = jnp.stack(w1l), jnp.stack(b1l)
    w2s, b2s = jnp.stack(w2l), jnp.stack(b2l)

    # tile_m=256 -> 2 batch tiles (even split across v7x's two TensorCores).
    out = drrnn_forward(x, w_in, b_in, w1s, b1s, w2s, b2s, w_out, b_out,
                        tile_m=256)
    out = jax.block_until_ready(out)

    # Pure-JAX reference with PyTorch semantics.
    hi = jax.lax.Precision.HIGHEST
    a = jnp.dot(x, w_in.T, precision=hi) + b_in[:, 0]
    for l in range(depth):
        h = jnp.tanh(jnp.dot(a, w1s[l].T, precision=hi) + b1s[l, :, 0])
        y = jnp.tanh(jnp.dot(h, w2s[l].T, precision=hi) + b2s[l, :, 0])
        a = y + a
    ref = jnp.dot(a, w_out.T, precision=hi) + b_out[:, 0]

    assert out.shape == (N, out_N)
    err = float(jnp.max(jnp.abs(out - ref)))
    assert jnp.allclose(out, ref, atol=2e-3, rtol=2e-3), f"max abs err = {err}"

    print("KERNEL_OK")
</pallas_src>

<mosaic_0001>
module attributes {stable_mosaic.version = 11 : i64} {
  func.func @drrnn_kernel(%arg0: i32, %arg1: memref<8x256xf32, #tpu.memory_space<vmem>>, %arg2: memref<32x8xf32, #tpu.memory_space<vmem>>, %arg3: memref<32x1xf32, #tpu.memory_space<vmem>>, %arg4: memref<4x32x32xf32, #tpu.memory_space<vmem>>, %arg5: memref<4x32x1xf32, #tpu.memory_space<vmem>>, %arg6: memref<4x32x32xf32, #tpu.memory_space<vmem>>, %arg7: memref<4x32x1xf32, #tpu.memory_space<vmem>>, %arg8: memref<8x32xf32, #tpu.memory_space<vmem>>, %arg9: memref<8x1xf32, #tpu.memory_space<vmem>>, %arg10: memref<8x256xf32, #tpu.memory_space<vmem>>) attributes {dimension_semantics = [#tpu.dimension_semantics<parallel>], iteration_bounds = array<i64: 2>, scalar_prefetch = 0 : i64, scratch_operands = 0 : i64, tpu.core_type = #tpu.core_type<tc>, window_params = [{transform_indices = @transform_0, window_bounds = array<i64: 8, 256>}, {pipeline_mode = #tpu.pipeline_mode<synchronous>, transform_indices = @transform_1, window_bounds = array<i64: 32, 8>}, {pipeline_mode = #tpu.pipeline_mode<synchronous>, transform_indices = @transform_2, window_bounds = array<i64: 32, 1>}, {pipeline_mode = #tpu.pipeline_mode<synchronous>, transform_indices = @transform_3, window_bounds = array<i64: 4, 32, 32>}, {pipeline_mode = #tpu.pipeline_mode<synchronous>, transform_indices = @transform_4, window_bounds = array<i64: 4, 32, 1>}, {pipeline_mode = #tpu.pipeline_mode<synchronous>, transform_indices = @transform_5, window_bounds = array<i64: 4, 32, 32>}, {pipeline_mode = #tpu.pipeline_mode<synchronous>, transform_indices = @transform_6, window_bounds = array<i64: 4, 32, 1>}, {pipeline_mode = #tpu.pipeline_mode<synchronous>, transform_indices = @transform_7, window_bounds = array<i64: 8, 32>}, {pipeline_mode = #tpu.pipeline_mode<synchronous>, transform_indices = @transform_8, window_bounds = array<i64: 8, 1>}, {transform_indices = @transform_9, window_bounds = array<i64: 8, 256>}]} {
    %c0 = arith.constant 0 : index
    %c0_0 = arith.constant 0 : index
    %0 = vector.load %arg1[%c0, %c0_0] : memref<8x256xf32, #tpu.memory_space<vmem>>, vector<8x256xf32>
    %c0_1 = arith.constant 0 : index
    %c0_2 = arith.constant 0 : index
    %1 = vector.load %arg2[%c0_1, %c0_2] : memref<32x8xf32, #tpu.memory_space<vmem>>, vector<32x8xf32>
    %cst = arith.constant dense<0.000000e+00> : vector<32x256xf32>
    %2 = tpu.matmul %1, %0, %cst {dimension_numbers = #tpu.dot_dimension_numbers<[1], [0], [0], [1], [0, 0, 1, 1], [], []>} : vector<32x8xf32>, vector<8x256xf32>, vector<32x256xf32> -> vector<32x256xf32>
    %c0_3 = arith.constant 0 : index
    %c0_4 = arith.constant 0 : index
    %3 = vector.load %arg3[%c0_3, %c0_4] : memref<32x1xf32, #tpu.memory_space<vmem>>, vector<32x1xf32>
    %4 = vector.broadcast %3 : vector<32x1xf32> to vector<32x256xf32>
    %5 = arith.addf %2, %4 : vector<32x256xf32>
    %c0_5 = arith.constant 0 : index
    %c0_6 = arith.constant 0 : index
    %c0_7 = arith.constant 0 : index
    %6 = vector.load %arg4[%c0_5, %c0_6, %c0_7] : memref<4x32x32xf32, #tpu.memory_space<vmem>>, vector<1x32x32xf32>
    %7 = vector.shape_cast %6 : vector<1x32x32xf32> to vector<32x32xf32>
    %cst_8 = arith.constant dense<0.000000e+00> : vector<32x256xf32>
    %8 = tpu.matmul %7, %5, %cst_8 {dimension_numbers = #tpu.dot_dimension_numbers<[1], [0], [0], [1], [0, 0, 1, 1], [], []>} : vector<32x32xf32>, vector<32x256xf32>, vector<32x256xf32> -> vector<32x256xf32>
    %c0_9 = arith.constant 0 : index
    %c0_10 = arith.constant 0 : index
    %c0_11 = arith.constant 0 : index
    %9 = vector.load %arg5[%c0_9, %c0_10, %c0_11] : memref<4x32x1xf32, #tpu.memory_space<vmem>>, vector<1x32x1xf32>
    %10 = vector.shape_cast %9 : vector<1x32x1xf32> to vector<32x1xf32>
    %11 = vector.broadcast %10 : vector<32x1xf32> to vector<32x256xf32>
    %12 = arith.addf %8, %11 : vector<32x256xf32>
    %13 = math.tanh %12 : vector<32x256xf32>
    %c0_12 = arith.constant 0 : index
    %c0_13 = arith.constant 0 : index
    %c0_14 = arith.constant 0 : index
    %14 = vector.load %arg6[%c0_12, %c0_13, %c0_14] : memref<4x32x32xf32, #tpu.memory_space<vmem>>, vector<1x32x32xf32>
    %15 = vector.shape_cast %14 : vector<1x32x32xf32> to vector<32x32xf32>
    %cst_15 = arith.constant dense<0.000000e+00> : vector<32x256xf32>
    %16 = tpu.matmul %15, %13, %cst_15 {dimension_numbers = #tpu.dot_dimension_numbers<[1], [0], [0], [1], [0, 0, 1, 1], [], []>} : vector<32x32xf32>, vector<32x256xf32>, vector<32x256xf32> -> vector<32x256xf32>
    %c0_16 = arith.constant 0 : index
    %c0_17 = arith.constant 0 : index
    %c0_18 = arith.constant 0 : index
    %17 = vector.load %arg7[%c0_16, %c0_17, %c0_18] : memref<4x32x1xf32, #tpu.memory_space<vmem>>, vector<1x32x1xf32>
    %18 = vector.shape_cast %17 : vector<1x32x1xf32> to vector<32x1xf32>
    %19 = vector.broadcast %18 : vector<32x1xf32> to vector<32x256xf32>
    %20 = arith.addf %16, %19 : vector<32x256xf32>
    %21 = math.tanh %20 : vector<32x256xf32>
    %22 = arith.addf %21, %5 : vector<32x256xf32>
    %c1 = arith.constant 1 : index
    %c0_19 = arith.constant 0 : index
    %c0_20 = arith.constant 0 : index
    %23 = vector.load %arg4[%c1, %c0_19, %c0_20] : memref<4x32x32xf32, #tpu.memory_space<vmem>>, vector<1x32x32xf32>
    %24 = vector.shape_cast %23 : vector<1x32x32xf32> to vector<32x32xf32>
    %cst_21 = arith.constant dense<0.000000e+00> : vector<32x256xf32>
    %25 = tpu.matmul %24, %22, %cst_21 {dimension_numbers = #tpu.dot_dimension_numbers<[1], [0], [0], [1], [0, 0, 1, 1], [], []>} : vector<32x32xf32>, vector<32x256xf32>, vector<32x256xf32> -> vector<32x256xf32>
    %c1_22 = arith.constant 1 : index
    %c0_23 = arith.constant 0 : index
    %c0_24 = arith.constant 0 : index
    %26 = vector.load %arg5[%c1_22, %c0_23, %c0_24] : memref<4x32x1xf32, #tpu.memory_space<vmem>>, vector<1x32x1xf32>
    %27 = vector.shape_cast %26 : vector<1x32x1xf32> to vector<32x1xf32>
    %28 = vector.broadcast %27 : vector<32x1xf32> to vector<32x256xf32>
    %29 = arith.addf %25, %28 : vector<32x256xf32>
    %30 = math.tanh %29 : vector<32x256xf32>
    %c1_25 = arith.constant 1 : index
    %c0_26 = arith.constant 0 : index
    %c0_27 = arith.constant 0 : index
    %31 = vector.load %arg6[%c1_25, %c0_26, %c0_27] : memref<4x32x32xf32, #tpu.memory_space<vmem>>, vector<1x32x32xf32>
    %32 = vector.shape_cast %31 : vector<1x32x32xf32> to vector<32x32xf32>
    %cst_28 = arith.constant dense<0.000000e+00> : vector<32x256xf32>
    %33 = tpu.matmul %32, %30, %cst_28 {dimension_numbers = #tpu.dot_dimension_numbers<[1], [0], [0], [1], [0, 0, 1, 1], [], []>} : vector<32x32xf32>, vector<32x256xf32>, vector<32x256xf32> -> vector<32x256xf32>
    %c1_29 = arith.constant 1 : index
    %c0_30 = arith.constant 0 : index
    %c0_31 = arith.constant 0 : index
    %34 = vector.load %arg7[%c1_29, %c0_30, %c0_31] : memref<4x32x1xf32, #tpu.memory_space<vmem>>, vector<1x32x1xf32>
    %35 = vector.shape_cast %34 : vector<1x32x1xf32> to vector<32x1xf32>
    %36 = vector.broadcast %35 : vector<32x1xf32> to vector<32x256xf32>
    %37 = arith.addf %33, %36 : vector<32x256xf32>
    %38 = math.tanh %37 : vector<32x256xf32>
    %39 = arith.addf %38, %22 : vector<32x256xf32>
    %c2 = arith.constant 2 : index
    %c0_32 = arith.constant 0 : index
    %c0_33 = arith.constant 0 : index
    %40 = vector.load %arg4[%c2, %c0_32, %c0_33] : memref<4x32x32xf32, #tpu.memory_space<vmem>>, vector<1x32x32xf32>
    %41 = vector.shape_cast %40 : vector<1x32x32xf32> to vector<32x32xf32>
    %cst_34 = arith.constant dense<0.000000e+00> : vector<32x256xf32>
    %42 = tpu.matmul %41, %39, %cst_34 {dimension_numbers = #tpu.dot_dimension_numbers<[1], [0], [0], [1], [0, 0, 1, 1], [], []>} : vector<32x32xf32>, vector<32x256xf32>, vector<32x256xf32> -> vector<32x256xf32>
    %c2_35 = arith.constant 2 : index
    %c0_36 = arith.constant 0 : index
    %c0_37 = arith.constant 0 : index
    %43 = vector.load %arg5[%c2_35, %c0_36, %c0_37] : memref<4x32x1xf32, #tpu.memory_space<vmem>>, vector<1x32x1xf32>
    %44 = vector.shape_cast %43 : vector<1x32x1xf32> to vector<32x1xf32>
    %45 = vector.broadcast %44 : vector<32x1xf32> to vector<32x256xf32>
    %46 = arith.addf %42, %45 : vector<32x256xf32>
    %47 = math.tanh %46 : vector<32x256xf32>
    %c2_38 = arith.constant 2 : index
    %c0_39 = arith.constant 0 : index
    %c0_40 = arith.constant 0 : index
    %48 = vector.load %arg6[%c2_38, %c0_39, %c0_40] : memref<4x32x32xf32, #tpu.memory_space<vmem>>, vector<1x32x32xf32>
    %49 = vector.shape_cast %48 : vector<1x32x32xf32> to vector<32x32xf32>
    %cst_41 = arith.constant dense<0.000000e+00> : vector<32x256xf32>
    %50 = tpu.matmul %49, %47, %cst_41 {dimension_numbers = #tpu.dot_dimension_numbers<[1], [0], [0], [1], [0, 0, 1, 1], [], []>} : vector<32x32xf32>, vector<32x256xf32>, vector<32x256xf32> -> vector<32x256xf32>
    %c2_42 = arith.constant 2 : index
    %c0_43 = arith.constant 0 : index
    %c0_44 = arith.constant 0 : index
    %51 = vector.load %arg7[%c2_42, %c0_43, %c0_44] : memref<4x32x1xf32, #tpu.memory_space<vmem>>, vector<1x32x1xf32>
    %52 = vector.shape_cast %51 : vector<1x32x1xf32> to vector<32x1xf32>
    %53 = vector.broadcast %52 : vector<32x1xf32> to vector<32x256xf32>
    %54 = arith.addf %50, %53 : vector<32x256xf32>
    %55 = math.tanh %54 : vector<32x256xf32>
    %56 = arith.addf %55, %39 : vector<32x256xf32>
    %c3 = arith.constant 3 : index
    %c0_45 = arith.constant 0 : index
    %c0_46 = arith.constant 0 : index
    %57 = vector.load %arg4[%c3, %c0_45, %c0_46] : memref<4x32x32xf32, #tpu.memory_space<vmem>>, vector<1x32x32xf32>
    %58 = vector.shape_cast %57 : vector<1x32x32xf32> to vector<32x32xf32>
    %cst_47 = arith.constant dense<0.000000e+00> : vector<32x256xf32>
    %59 = tpu.matmul %58, %56, %cst_47 {dimension_numbers = #tpu.dot_dimension_numbers<[1], [0], [0], [1], [0, 0, 1, 1], [], []>} : vector<32x32xf32>, vector<32x256xf32>, vector<32x256xf32> -> vector<32x256xf32>
    %c3_48 = arith.constant 3 : index
    %c0_49 = arith.constant 0 : index
    %c0_50 = arith.constant 0 : index
    %60 = vector.load %arg5[%c3_48, %c0_49, %c0_50] : memref<4x32x1xf32, #tpu.memory_space<vmem>>, vector<1x32x1xf32>
    %61 = vector.shape_cast %60 : vector<1x32x1xf32> to vector<32x1xf32>
    %62 = vector.broadcast %61 : vector<32x1xf32> to vector<32x256xf32>
    %63 = arith.addf %59, %62 : vector<32x256xf32>
    %64 = math.tanh %63 : vector<32x256xf32>
    %c3_51 = arith.constant 3 : index
    %c0_52 = arith.constant 0 : index
    %c0_53 = arith.constant 0 : index
    %65 = vector.load %arg6[%c3_51, %c0_52, %c0_53] : memref<4x32x32xf32, #tpu.memory_space<vmem>>, vector<1x32x32xf32>
    %66 = vector.shape_cast %65 : vector<1x32x32xf32> to vector<32x32xf32>
    %cst_54 = arith.constant dense<0.000000e+00> : vector<32x256xf32>
    %67 = tpu.matmul %66, %64, %cst_54 {dimension_numbers = #tpu.dot_dimension_numbers<[1], [0], [0], [1], [0, 0, 1, 1], [], []>} : vector<32x32xf32>, vector<32x256xf32>, vector<32x256xf32> -> vector<32x256xf32>
    %c3_55 = arith.constant 3 : index
    %c0_56 = arith.constant 0 : index
    %c0_57 = arith.constant 0 : index
    %68 = vector.load %arg7[%c3_55, %c0_56, %c0_57] : memref<4x32x1xf32, #tpu.memory_space<vmem>>, vector<1x32x1xf32>
    %69 = vector.shape_cast %68 : vector<1x32x1xf32> to vector<32x1xf32>
    %70 = vector.broadcast %69 : vector<32x1xf32> to vector<32x256xf32>
    %71 = arith.addf %67, %70 : vector<32x256xf32>
    %72 = math.tanh %71 : vector<32x256xf32>
    %73 = arith.addf %72, %56 : vector<32x256xf32>
    %c0_58 = arith.constant 0 : index
    %c0_59 = arith.constant 0 : index
    %74 = vector.load %arg8[%c0_58, %c0_59] : memref<8x32xf32, #tpu.memory_space<vmem>>, vector<8x32xf32>
    %cst_60 = arith.constant dense<0.000000e+00> : vector<8x256xf32>
    %75 = tpu.matmul %74, %73, %cst_60 {dimension_numbers = #tpu.dot_dimension_numbers<[1], [0], [0], [1], [0, 0, 1, 1], [], []>} : vector<8x32xf32>, vector<32x256xf32>, vector<8x256xf32> -> vector<8x256xf32>
    %c0_61 = arith.constant 0 : index
    %c0_62 = arith.constant 0 : index
    %76 = vector.load %arg9[%c0_61, %c0_62] : memref<8x1xf32, #tpu.memory_space<vmem>>, vector<8x1xf32>
    %77 = vector.broadcast %76 : vector<8x1xf32> to vector<8x256xf32>
    %78 = arith.addf %75, %77 : vector<8x256xf32>
    %c0_63 = arith.constant 0 : index
    %c0_64 = arith.constant 0 : index
    %79 = vector.load %arg10[%c0_63, %c0_64] : memref<8x256xf32, #tpu.memory_space<vmem>>, vector<8x256xf32>
    tpu.vector_store %arg10[%c0_63, %c0_64], %78 {strides = array<i32>} : memref<8x256xf32, #tpu.memory_space<vmem>>, vector<8x256xf32>,
    return
  }
  func.func @transform_0(%arg0: i32) -> (i32, i32) {
    %c0_i32 = arith.constant 0 : i32
    %c0_i32_0 = arith.constant 0 : i32
    return %c0_i32, %arg0 : i32, i32
  }
  func.func @transform_1(%arg0: i32) -> (i32, i32) {
    %c0_i32 = arith.constant 0 : i32
    %c0_i32_0 = arith.constant 0 : i32
    %c0_i32_1 = arith.constant 0 : i32
    return %c0_i32, %c0_i32_0 : i32, i32
  }
  func.func @transform_2(%arg0: i32) -> (i32, i32) {
    %c0_i32 = arith.constant 0 : i32
    %c0_i32_0 = arith.constant 0 : i32
    %c0_i32_1 = arith.constant 0 : i32
    return %c0_i32, %c0_i32_0 : i32, i32
  }
  func.func @transform_3(%arg0: i32) -> (i32, i32, i32) {
    %c0_i32 = arith.constant 0 : i32
    %c0_i32_0 = arith.constant 0 : i32
    %c0_i32_1 = arith.constant 0 : i32
    %c0_i32_2 = arith.constant 0 : i32
    return %c0_i32, %c0_i32_0, %c0_i32_1 : i32, i32, i32
  }
  func.func @transform_4(%arg0: i32) -> (i32, i32, i32) {
    %c0_i32 = arith.constant 0 : i32
    %c0_i32_0 = arith.constant 0 : i32
    %c0_i32_1 = arith.constant 0 : i32
    %c0_i32_2 = arith.constant 0 : i32
    return %c0_i32, %c0_i32_0, %c0_i32_1 : i32, i32, i32
  }
  func.func @transform_5(%arg0: i32) -> (i32, i32, i32) {
    %c0_i32 = arith.constant 0 : i32
    %c0_i32_0 = arith.constant 0 : i32
    %c0_i32_1 = arith.constant 0 : i32
    %c0_i32_2 = arith.constant 0 : i32
    return %c0_i32, %c0_i32_0, %c0_i32_1 : i32, i32, i32
  }
  func.func @transform_6(%arg0: i32) -> (i32, i32, i32) {
    %c0_i32 = arith.constant 0 : i32
    %c0_i32_0 = arith.constant 0 : i32
    %c0_i32_1 = arith.constant 0 : i32
    %c0_i32_2 = arith.constant 0 : i32
    return %c0_i32, %c0_i32_0, %c0_i32_1 : i32, i32, i32
  }
  func.func @transform_7(%arg0: i32) -> (i32, i32) {
    %c0_i32 = arith.constant 0 : i32
    %c0_i32_0 = arith.constant 0 : i32
    %c0_i32_1 = arith.constant 0 : i32
    return %c0_i32, %c0_i32_0 : i32, i32
  }
  func.func @transform_8(%arg0: i32) -> (i32, i32) {
    %c0_i32 = arith.constant 0 : i32
    %c0_i32_0 = arith.constant 0 : i32
    %c0_i32_1 = arith.constant 0 : i32
    return %c0_i32, %c0_i32_0 : i32, i32
  }
  func.func @transform_9(%arg0: i32) -> (i32, i32) {
    %c0_i32 = arith.constant 0 : i32
    %c0_i32_0 = arith.constant 0 : i32
    return %c0_i32, %arg0 : i32, i32
  }
}

</mosaic_0001>

<bundles_post_ra>
// kernel: tpu_custom_call.1
= control target key start
LH: loop header
LB: loop body
LE: loop exit
PB: predicated region body
PF: predicated region fallthrough
CT: control target
= control target key end

     0   :  { %14 = vsyncpa [#allocation3], 0  ;;  %s2660_s0 = inlined_call_operand.vmem [shape: f32[8,512], index: 0, kind: input, shape index: {}]   ;;  %s2661_s1 = inlined_call_operand.vmem [shape: f32[32,8], index: 1, kind: input, shape index: {}]   ;;  %s2662_s2 = inlined_call_operand.vmem [shape: f32[32,1], index: 2, kind: input, shape index: {}]   ;;  %s2663_s3 = inlined_call_operand.vmem [shape: f32[4,32,32], index: 3, kind: input, shape index: {}]   ;;  %s2664_s4 = inlined_call_operand.vmem [shape: f32[4,32,1], index: 4, kind: input, shape index: {}]   ;;  %s2665_s5 = inlined_call_operand.vmem [shape: f32[4,32,32], index: 5, kind: input, shape index: {}]   ;;  %s2666_s6 = inlined_call_operand.vmem [shape: f32[4,32,1], index: 6, kind: input, shape index: {}]   ;;  %s2667_s7 = inlined_call_operand.vmem [shape: f32[8,32], index: 7, kind: input, shape index: {}]   ;;  %s2668_s8 = inlined_call_operand.vmem [shape: f32[8,1], index: 8, kind: input, shape index: {}]   ;;  %s2669_s9 = inlined_call_operand.hbm [shape: f32[8,512], index: 9, kind: output, shape index: {}]  }
   0x1   :  { %16 = vsyncpa [#allocation3 + $0x1], 0  ;;  %s2150_s30 = smov 0   ;;  %s2152_s10 = smov 0  }
   0x2   :  { %s2154_s11 = smov 0   ;;  %s2156_s12 = smov 0  }
   0x3 LB: > { %s2171_s13 = sadd.s32 4294967295, %s2095_s12   ;;  %s1764_s14 = sadd.s32 4294967294, %s2095_s12   ;;  %s2095_s12 = sphi %s2156_s12, %s2675_s12   ;;  %s2091_s11 = sphi %s2154_s11, %s2674_s11   ;;  %s2087_s10 = sphi %s2152_s10, %s2673_s10   ;;  %s2083_s30 = sphi %s2150_s30, %s2672_s30  }
   0x4   : > { %s2175_s15 = sadd.s32 1, %s2095_s12   ;;  %s223_s16 = sadd.s32 1, %s2091_s11 }
   0x5   : > { %s220_s17 = ssub.s32 %s2095_s12, %s2175_s15  ;;  %p233_p0 = scmp.ne.s32.totalorder %s2091_s11, %s2087_s10 }
   0x6   : > { %p221_p1 = scmp.eq.s32.totalorder %s220_s17, 0  ;;  %p234_p2 = scmp.eq.s32.totalorder %s2171_s13, 1 }
   0x7   : > { %p239_p3 = scmp.ne.s32.totalorder %s2087_s10, %s2083_s30  ;;  %p240_p4 = scmp.eq.s32.totalorder %s1764_s14, 1 }
   0x8   : > { %s2186_s18 = scalar_select %p221_p1, %s2091_s11, %s223_s16  }
   0x9   : > { %p2188_p5 = por %p234_p2, %p233_p0  ;;  %p2192_p6 = por %p240_p4, %p239_p3 }
   0xa   : > { %p1767_p7 = scmp.ge.s32.totalorder %s2095_s12, 1  ;;  %p291_p8 = scmp.lt.s32.totalorder %s2095_s12, 3 }
   0xc   : > { %p292_p9 = pnand %p1767_p7, %p291_p8 }
   0xd   : > { %s1769_s21 = sshll.u32 (!%p292_p9), %s2171_s13, 1  ;;  %s324_s14 = sand.u32 (!%p292_p9), 1, %s2087_s10  }
   0xe   : > { %295 = sbr.rel (%p292_p9) target bundleno = 2301 (0x8fd), region = 56  ;;  %p328_p10 = scmp.lt.s32.totalorder (!%p292_p9), %s1769_s21, 3 }
   0xf   : > { %s1861_s17 = sshll.u32 (!%p292_p9), %s2171_s13, 8  ;;  %s1691_s26 = scalar_lea.sflag (!%p292_p9), [#allocation3], %s324_s14 }
  0x10   : > { %s1703_s25 = scalar_lea.hbm (!%p292_p9), %s2669_s9, %s1861_s17 }
  0x13   : > { %v343_v0 = vld [vmem:[%s2662_s2 + $0x18] sm:$0xff]  ;;  %v2097_v1 = vmov 0.0   ;;  %v2098_v2 = vmov 0   ;;  %v341_v3 = vld [vmem:[%s2662_s2 + $0x8] sm:$0xff]  ;;  %s2677_s21 = smov (!%p328_p10, %s1769_s21), 3  ;;  %v342_v4 = vld [vmem:[%s2662_s2 + $0x10] sm:$0xff] }
  0x14   : > { %453 = vmatprep.mubr.f32.mxu1 %v2097_v1  ;;  %1905 = vset.pattern.permute.xlu0 %v2098_v2  ;;  %s1770_s28 = sshll.u32 %s2677_s21, 3  ;;  %v338_v5 = vld [vmem:[%s2661_s1 + $0x10] sm:$0xff]  ;;  %vm364_vm0 = vcmask 64512   ;;  %v336_v8 = vld [vmem:[%s2661_s1] sm:$0xff]  ;;  %v473_v9 = vld [vmem:[%s2664_s4 + $0x18] sm:$0xff]  ;;  %vm494_vm1 = vcmask 261120  }
  0x15   : > { %441 = vmatprep.mubr.f32.mxu0 %v2097_v1  ;;  %361 = vperm.xlu0 %1905, %v343_v0   ;;  %s331_s16 = scalar_lea.vmem %s2660_s0, %s1770_s28  ;;  %v340_v10 = vld [vmem:[%s2662_s2] sm:$0xff]  ;;  %v339_v11 = vld [vmem:[%s2661_s1 + $0x18] sm:$0xff]  ;;  %v337_v12 = vld [vmem:[%s2661_s1 + $0x8] sm:$0xff]  ;;  %s2099_s28 = smov [#allocation2]  }
  0x16   : > { %1906 = vset.pattern.permute.xlu1 %v2098_v2  ;;  %v335_v6 = vld [vmem:[%s331_s16 + $0x8] sm:$0xff]  ;;  %v334_v7 = vld [vmem:[%s331_s16] sm:$0xff]  ;;  %v472_v14 = vld [vmem:[%s2664_s4 + $0x10] sm:$0xff]  ;;  %s1768_s16 = sshll.u32 %s324_s14, 4  ;;  %s2039_s13 = sshll.u32 %s2099_s28, 4  ;;  %s2040_s13 = int_to_ptr.vmem [resolvable:$false] %s2039_s13 }
  0x17   : > { %351 = vperm.xlu1 %1906, %v341_v3   ;;  %1862 = vmatprep.subr.mxu1 %v335_v6  ;;  %v471_v13 = vld [vmem:[%s2664_s4 + $0x8] sm:$0xff]  ;;  %v611_v15 = vld [vmem:[%s2666_s6 + $0x18] sm:$0xff]  ;;  %v470_v16 = vld [vmem:[%s2664_s4] sm:$0xff]  ;;  %s326_s22 = scalar_lea.vmem [#allocation2], %s1768_s16  ;;  %s2041_s29 = scalar_lea.vmem %s2040_s13, 512 }
  0x18   : > { %407 = vmatprep.subr.mxu0 %v335_v6  ;;  %1863 = vmatpush1.msra.mxu1 %v334_v7  ;;  %v609_v17 = vld [vmem:[%s2666_s6 + $0x8] sm:$0xff]  ;;  %v610_v18 = vld [vmem:[%s2666_s6 + $0x10] sm:$0xff]  ;;  %v1790_v19 = vld [vmem:[%s2664_s4 + $0x38] sm:$0xff]  ;;  %s1705_s23 = sshll.u32 %s326_s22, 4  ;;  %s1706_s23 = int_to_ptr.vmem [resolvable:$true] %s1705_s23 }
  0x19   : > { %356 = vperm.xlu0 %1905, %v342_v4   ;;  %408 = vmatpush1.msra.mxu0 %v334_v7  ;;  %v608_v20 = vld [vmem:[%s2666_s6] sm:$0xff]  ;;  %v1788_v21 = vld [vmem:[%s2664_s4 + $0x28] sm:$0xff]  ;;  %v1789_v22 = vld [vmem:[%s2664_s4 + $0x30] sm:$0xff]  ;;  %s2035_s27 = scalar_lea.vmem %s1706_s23, 256  ;;  %p2042_p0 = scmp.lt.s32.totalorder %s1706_s23, %s2040_s13 }
  0x1a   : > { %1773 = vmatmul.mubr.msk.f32.vlgmr.msra.gmra.mxu1 %vm364_vm0, %v338_v5  ;;  %1771 = vmatmul.mubr.msk.f32.vlgmr.msra.gmra.mxu0 %vm364_vm0, %v336_v8  ;;  %v1802_v23 = vld [vmem:[%s2666_s6 + $0x38] sm:$0xff]  ;;  %v1787_v24 = vld [vmem:[%s2664_s4 + $0x20] sm:$0xff]  ;;  %v1800_v25 = vld [vmem:[%s2666_s6 + $0x28] sm:$0xff]  ;;  %p2036_p11 = scmp.ne.s32.totalorder %s1706_s23, %s2035_s27  ;;  %p2043_p1 = scmp.lt.s32.totalorder %s2041_s29, %s2035_s27 }
  0x1b   : > { %459 = vmatprep.mubr.f32.mxu1 %v2097_v1  ;;  %447 = vmatprep.mubr.f32.mxu0 %v2097_v1  ;;  %v1801_v26 = vld [vmem:[%s2666_s6 + $0x30] sm:$0xff]  ;;  %v1814_v27 = vld [vmem:[%s2664_s4 + $0x58] sm:$0xff]  ;;  %v1799_v28 = vld [vmem:[%s2666_s6 + $0x20] sm:$0xff] }
  0x1c   : > { %346 = vperm.xlu1 %1906, %v340_v10   ;;  %v1812_v29 = vld [vmem:[%s2664_s4 + $0x48] sm:$0xff]  ;;  %v1813_v30 = vld [vmem:[%s2664_s4 + $0x50] sm:$0xff]  ;;  %v1826_v31 = vld [vmem:[%s2666_s6 + $0x58] sm:$0xff]  ;;  %p2037_p12 = pnand %p2036_p11, %p2188_p5  ;;  %p2044_p2 = por %p2043_p1, %p2042_p0 }
  0x1d   : > { %491 = vperm.xlu0 %1905, %v473_v9   ;;  %v1811_v32 = vld [vmem:[%s2664_s4 + $0x40] sm:$0xff]  ;;  %v1824_v33 = vld [vmem:[%s2666_s6 + $0x48] sm:$0xff]  ;;  %v1825_v34 = vld [vmem:[%s2666_s6 + $0x50] sm:$0xff] }
  0x1e   : > { %1774 = vmatmul.mubr.msk.f32.gmra.mxu1 %vm364_vm0, %v339_v11  ;;  %1772 = vmatmul.mubr.msk.f32.gmra.mxu0 %vm364_vm0, %v337_v12  ;;  %v1838_v35 = vld [vmem:[%s2664_s4 + $0x78] sm:$0xff]  ;;  %v1823_v36 = vld [vmem:[%s2666_s6 + $0x40] sm:$0xff]  ;;  %v1836_v37 = vld [vmem:[%s2664_s4 + $0x68] sm:$0xff]  ;;  %p2038_p13 = pneg %p2037_p12 }
  0x1f   : > { %571 = vmatprep.mubr.f32.mxu1 %v2097_v1  ;;  %708 = vmatprep.mubr.f32.mxu0 %v2097_v1  ;;  %v1837_v38 = vld [vmem:[%s2664_s4 + $0x70] sm:$0xff]  ;;  %v1850_v39 = vld [vmem:[%s2666_s6 + $0x78] sm:$0xff]  ;;  %v1835_v40 = vld [vmem:[%s2664_s4 + $0x60] sm:$0xff] }
  0x20   : > { %486 = vperm.xlu1 %1906, %v472_v14   ;;  %v1848_v41 = vld [vmem:[%s2666_s6 + $0x68] sm:$0xff]  ;;  %v1849_v42 = vld [vmem:[%s2666_s6 + $0x70] sm:$0xff]  ;;  %v1608_v43 = vld [vmem:[%s2668_s8] sm:$0xff]  ;;  %p2045_p3 = pnand %p2044_p2, %p2038_p13 }
  0x21   : > { %481 = vperm.xlu0 %1905, %v471_v13   ;;  %v1847_v44 = vld [vmem:[%s2666_s6 + $0x60] sm:$0xff]  ;;  %v467_v3 = vld [vmem:[%s2663_s3 + $0x8] sm:$0xff]  ;;  %v468_v4 = vld [vmem:[%s2663_s3 + $0x10] sm:$0xff] }
  0x22   : > { %v466_v2 = vld [vmem:[%s2663_s3] sm:$0xff]  ;;  %v469_v5 = vld [vmem:[%s2663_s3 + $0x18] sm:$0xff] }
  0x24   : > { %476 = vperm.xlu1 %1906, %v470_v16  }
  0x25   : > { %629 = vperm.xlu0 %1905, %v611_v15  }
  0x28   : > { %624 = vperm.xlu1 %1906, %v610_v18  }
  0x29   : > { %619 = vperm.xlu0 %1905, %v609_v17  }
  0x2c   : > { %614 = vperm.xlu1 %1906, %v608_v20  }
  0x2d   : > { %776 = vperm.xlu0 %1905, %v1790_v19  }
  0x30   : > { %771 = vperm.xlu1 %1906, %v1789_v22  }
  0x31   : > { %766 = vperm.xlu0 %1905, %v1788_v21  }
  0x34   : > { %761 = vperm.xlu1 %1906, %v1787_v24  }
  0x35   : > { %915 = vperm.xlu0 %1905, %v1802_v23  }
  0x38   : > { %910 = vperm.xlu1 %1906, %v1801_v26  }
  0x39   : > { %905 = vperm.xlu0 %1905, %v1800_v25  }
  0x3c   : > { %900 = vperm.xlu1 %1906, %v1799_v28  }
  0x3d   : > { %1062 = vperm.xlu0 %1905, %v1814_v27  }
  0x40   : > { %1057 = vperm.xlu1 %1906, %v1813_v30  }
  0x41   : > { %1052 = vperm.xlu0 %1905, %v1812_v29  }
  0x44   : > { %1047 = vperm.xlu1 %1906, %v1811_v32  }
  0x45   : > { %1201 = vperm.xlu0 %1905, %v1826_v31  }
  0x48   : > { %1196 = vperm.xlu1 %1906, %v1825_v34  }
  0x49   : > { %1191 = vperm.xlu0 %1905, %v1824_v33   ;;  %v604_v33 = vld [vmem:[%s2665_s5] sm:$0xff] }
  0x4c   : > { %1186 = vperm.xlu1 %1906, %v1823_v36   ;;  %v606_v36 = vld [vmem:[%s2665_s5 + $0x10] sm:$0xff] }
  0x4d   : > { %1348 = vperm.xlu0 %1905, %v1838_v35   ;;  %v605_v35 = vld [vmem:[%s2665_s5 + $0x8] sm:$0xff] }
  0x50   : > { %1343 = vperm.xlu1 %1906, %v1837_v38  }
  0x51   : > { %1338 = vperm.xlu0 %1905, %v1836_v37   ;;  %v607_v37 = vld [vmem:[%s2665_s5 + $0x18] sm:$0xff] }
  0x54   : > { %1333 = vperm.xlu1 %1906, %v1835_v40  }
  0x55   : > { %1487 = vperm.xlu0 %1905, %v1850_v39  }
  0x58   : > { %1482 = vperm.xlu1 %1906, %v1849_v42  }
  0x59   : > { %1477 = vperm.xlu0 %1905, %v1848_v41  }
  0x5c   : > { %1472 = vperm.xlu1 %1906, %v1847_v44  }
  0x5d   : > { %1611 = vperm.xlu0 %1905, %v1608_v43  }
  0x90   : > { %v362_v47 = vpop.permute.xlu0 %361 }
  0x92   : > { %v352_v52 = vpop.permute.xlu1 %351 }
  0x94   : > { %v357_v55 = vpop.permute.xlu0 %356 }
  0x97   : > { %v347_v61 = vpop.permute.xlu1 %346 }
  0x98   : > { %v492_v11 = vpop.permute.xlu0 %491 }
  0x9b   : > { %v487_v13 = vpop.permute.xlu1 %486 }
  0x9c   : > { %v482_v19 = vpop.permute.xlu0 %481 }
  0x9f   : > { %v477_v22 = vpop.permute.xlu1 %476 }
  0xa0   : > { %v630_v42 = vpop.permute.xlu0 %629 }
  0xa3   : > { %v625_v44 = vpop.permute.xlu1 %624 }
  0xda   : > { %v455_v45 = vpop.f32.mrf.mxu1  ;;  %v443_v46 = vpop.f32.mrf.mxu0 }
  0xdb   : > { %v2342_v59 = vadd.f32 %v455_v45, %v357_v55  ;;  %v2354_v0 = vadd.f32 %v443_v46, %v347_v61 }
  0xdc   : > { %v457_v48 = vpop.f32.mrf.mxu1  ;;  %v445_v49 = vpop.f32.mrf.mxu0 }
  0xdd   : > { %v2339_v58 = vadd.f32 %v457_v48, %v357_v55  ;;  %v2351_v63 = vadd.f32 %v445_v49, %v347_v61  ;;  %v620_v49 = vpop.permute.xlu0 %619  ;;  %v615_v55 = vpop.permute.xlu1 %614 }
  0xde   : > { %v461_v50 = vpop.f32.mrf.mxu1  ;;  %v449_v51 = vpop.f32.mrf.mxu0 }
  0xdf   : > { %v2337_v56 = vadd.f32 %v461_v50, %v362_v47  ;;  %v2348_v62 = vadd.f32 %v449_v51, %v352_v52 }
  0xe0   : > { %v463_v53 = vpop.f32.mrf.mxu1  ;;  %v451_v57 = vpop.f32.mrf.mxu0 }
  0xe1   : > { %v2335_v54 = vadd.f32 %v463_v53, %v362_v47  ;;  %v2345_v60 = vadd.f32 %v451_v57, %v352_v52 }
  0xe3   : > { %531 = vmatprep.subr.mxu1 %v2335_v54 }
  0xe4   : > { %532 = vmatpush1.msra.mxu1 %v2337_v56 }
  0xe5   : > { %533 = vmatprep.subr.mxu1 %v2339_v58 }
  0xe6   : > { %534 = vmatpush1.msra.mxu1 %v2342_v59 }
  0xe7   : > { %535 = vmatprep.subr.mxu1 %v2345_v60 }
  0xe8   : > { %536 = vmatpush1.msra.mxu1 %v2348_v62 }
  0xe9   : > { %537 = vmatprep.subr.mxu1 %v2351_v63 }
  0xea   : > { %538 = vmatpush1.msra.mxu1 %v2354_v0 }
  0xeb   : > { %1775 = vmatmul.mubr.msk.f32.vlgmr.msra.gmra.mxu1 %vm494_vm1, %v466_v2 }
  0xec   : > { %577 = vmatprep.mubr.f32.mxu1 %v2097_v1 }
  0xef   : > { %1776 = vmatmul.mubr.msk.f32.gmra.mxu1 %vm494_vm1, %v467_v3 }
  0xf0   : > { %583 = vmatprep.mubr.f32.mxu1 %v2097_v1 }
  0xf3   : > { %1777 = vmatmul.mubr.msk.f32.gmra.mxu1 %vm494_vm1, %v468_v4 }
  0xf4   : > { %589 = vmatprep.mubr.f32.mxu1 %v2097_v1 }
  0xf7   : > { %1778 = vmatmul.mubr.msk.f32.gmra.mxu1 %vm494_vm1, %v469_v5 }
  0xf8   : > { %855 = vmatprep.mubr.f32.mxu1 %v2097_v1 }
 0x1ab   : > { %v573_v6 = vpop.f32.mrf.mxu1 }
 0x1ac   : > { %v574_v25 = vadd.f32 %v573_v6, %v477_v22 }
 0x1ad   : > { %v575_v7 = vpop.f32.mrf.mxu1 }
 0x1ae   : > { %v576_v24 = vadd.f32 %v575_v7, %v477_v22  ;;  %v772_v22 = vpop.permute.xlu1 %771 }
 0x1af   : > { %v579_v8 = vpop.f32.mrf.mxu1 }
 0x1b0   : > { %v580_v23 = vadd.f32 %v579_v8, %v482_v19 }
 0x1b1   : > { %v581_v9 = vpop.f32.mrf.mxu1 }
 0x1b2   : > { %v582_v21 = vadd.f32 %v581_v9, %v482_v19 }
 0x1b3   : > { %v585_v10 = vpop.f32.mrf.mxu1 }
 0x1b4   : > { %v586_v20 = vadd.f32 %v585_v10, %v487_v13 }
 0x1b5   : > { %v587_v12 = vpop.f32.mrf.mxu1 }
 0x1b6   : > { %v588_v17 = vadd.f32 %v587_v12, %v487_v13 }
 0x1b7   : > { %v591_v14 = vpop.f32.mrf.mxu1 }
 0x1b8   : > { %v592_v15 = vadd.f32 %v591_v14, %v492_v11 }
 0x1b9   : > { %v593_v16 = vpop.f32.mrf.mxu1 }
 0x1ba   : > { %v594_v18 = vadd.f32 %v593_v16, %v492_v11 }
 0x1bc   : > { %1907 = vtanh.f32 %v594_v18 }
 0x1bd   : > { %1909 = vtanh.f32 %v592_v15 }
 0x1be   : > { %1911 = vtanh.f32 %v588_v17 }
 0x1bf   : > { %1913 = vtanh.f32 %v586_v20  ;;  %v777_v20 = vpop.permute.xlu0 %776 }
 0x1c0   : > { %1915 = vtanh.f32 %v582_v21 }
 0x1c1   : > { %1917 = vtanh.f32 %v580_v23 }
 0x1c2   : > { %1919 = vtanh.f32 %v576_v24 }
 0x1c3   : > { %1921 = vtanh.f32 %v574_v25 }
 0x1c9   : > { %v1908_v26 = vpop.eup %1907 }
 0x1ca   : > { %v1910_v27 = vpop.eup %1909  ;;  %668 = vmatprep.subr.mxu0 %v1908_v26 }
 0x1cb   : > { %v1912_v28 = vpop.eup %1911  ;;  %669 = vmatpush1.msra.mxu0 %v1910_v27 }
 0x1cc   : > { %v1914_v29 = vpop.eup %1913  ;;  %670 = vmatprep.subr.mxu0 %v1912_v28  ;;  %v767_v28 = vpop.permute.xlu0 %766 }
 0x1cd   : > { %v1916_v30 = vpop.eup %1915  ;;  %671 = vmatpush1.msra.mxu0 %v1914_v29 }
 0x1ce   : > { %v1918_v31 = vpop.eup %1917  ;;  %672 = vmatprep.subr.mxu0 %v1916_v30 }
 0x1cf   : > { %v1920_v32 = vpop.eup %1919  ;;  %673 = vmatpush1.msra.mxu0 %v1918_v31  ;;  %v762_v31 = vpop.permute.xlu1 %761 }
 0x1d0   : > { %v1922_v34 = vpop.eup %1921  ;;  %674 = vmatprep.subr.mxu0 %v1920_v32 }
 0x1d1   : > { %675 = vmatpush1.msra.mxu0 %v1922_v34 }
 0x1d2   : > { %1779 = vmatmul.mubr.msk.f32.vlgmr.msra.gmra.mxu0 %vm494_vm1, %v604_v33 }
 0x1d3   : > { %714 = vmatprep.mubr.f32.mxu0 %v2097_v1 }
 0x1d6   : > { %1780 = vmatmul.mubr.msk.f32.gmra.mxu0 %vm494_vm1, %v605_v35 }
 0x1d7   : > { %720 = vmatprep.mubr.f32.mxu0 %v2097_v1 }
 0x1da   : > { %1781 = vmatmul.mubr.msk.f32.gmra.mxu0 %vm494_vm1, %v606_v36 }
 0x1db   : > { %726 = vmatprep.mubr.f32.mxu0 %v2097_v1 }
 0x1de   : > { %1782 = vmatmul.mubr.msk.f32.gmra.mxu0 %vm494_vm1, %v607_v37 }
 0x1df   : > { %994 = vmatprep.mubr.f32.mxu0 %v2097_v1 }
 0x292   : > { %v710_v38 = vpop.f32.mrf.mxu0 }
 0x293   : > { %v711_v2 = vadd.f32 %v710_v38, %v615_v55 }
 0x294   : > { %v712_v39 = vpop.f32.mrf.mxu0 }
 0x295   : > { %v713_v61 = vadd.f32 %v712_v39, %v615_v55 }
 0x296   : > { %v716_v40 = vpop.f32.mrf.mxu0 }
 0x297   : > { %v717_v57 = vadd.f32 %v716_v40, %v620_v49 }
 0x298   : > { %v718_v41 = vpop.f32.mrf.mxu0 }
 0x299   : > { %v719_v52 = vadd.f32 %v718_v41, %v620_v49 }
 0x29a   : > { %v722_v43 = vpop.f32.mrf.mxu0 }
 0x29b   : > { %v723_v50 = vadd.f32 %v722_v43, %v625_v44 }
 0x29c   : > { %v724_v45 = vpop.f32.mrf.mxu0 }
 0x29d   : > { %v725_v46 = vadd.f32 %v724_v45, %v625_v44  ;;  %v1796_v44 = vld [vmem:[%s2665_s5 + $0x28] sm:$0xff]  ;;  %v1797_v45 = vld [vmem:[%s2665_s5 + $0x30] sm:$0xff] }
 0x29e   : > { %v728_v47 = vpop.f32.mrf.mxu0 }
 0x29f   : > { %v729_v48 = vadd.f32 %v728_v47, %v630_v42  ;;  %1923 = vtanh.f32 %v725_v46  ;;  %v1798_v46 = vld [vmem:[%s2665_s5 + $0x38] sm:$0xff] }
 0x2a0   : > { %v730_v51 = vpop.f32.mrf.mxu0 }
 0x2a1   : > { %v731_v53 = vadd.f32 %v730_v51, %v630_v42  ;;  %1925 = vtanh.f32 %v729_v48  ;;  %v1795_v42 = vld [vmem:[%s2665_s5 + $0x20] sm:$0xff]  ;;  %v916_v51 = vpop.permute.xlu0 %915 }
 0x2a3   : > { %1927 = vtanh.f32 %v731_v53  ;;  %v911_v53 = vpop.permute.xlu1 %910 }
 0x2a4   : > { %1929 = vtanh.f32 %v723_v50 }
 0x2a5   : > { %1931 = vtanh.f32 %v719_v52 }
 0x2a6   : > { %1933 = vtanh.f32 %v717_v57 }
 0x2a7   : > { %1935 = vtanh.f32 %v713_v61 }
 0x2a8   : > { %1937 = vtanh.f32 %v711_v2 }
 0x2ac   : > { %v1924_v3 = vpop.eup %1923 }
 0x2ad   : > { %v2407_v11 = vadd.f32 %v1924_v3, %v2339_v58  ;;  %v906_v3 = vpop.permute.xlu0 %905 }
 0x2ae   : > { %v1926_v4 = vpop.eup %1925 }
 0x2af   : > { %v2403_v9 = vadd.f32 %v1926_v4, %v2337_v56 }
 0x2b0   : > { %v1928_v5 = vpop.eup %1927 }
 0x2b1   : > { %v1930_v6 = vpop.eup %1929  ;;  %v2400_v7 = vadd.f32 %v1928_v5, %v2335_v54 }
 0x2b2   : > { %v1932_v8 = vpop.eup %1931  ;;  %v2411_v13 = vadd.f32 %v1930_v6, %v2342_v59 }
 0x2b3   : > { %v1934_v10 = vpop.eup %1933  ;;  %815 = vmatprep.subr.mxu1 %v2400_v7  ;;  %v2415_v54 = vadd.f32 %v1932_v8, %v2345_v60  ;;  %v1783_v60 = vld [vmem:[%s2663_s3 + $0x20] sm:$0xff] }
 0x2b4   : > { %v1936_v12 = vpop.eup %1935  ;;  %816 = vmatpush1.msra.mxu1 %v2403_v9  ;;  %v2419_v56 = vadd.f32 %v1934_v10, %v2348_v62  ;;  %v1784_v62 = vld [vmem:[%s2663_s3 + $0x28] sm:$0xff]  ;;  %v901_v10 = vpop.permute.xlu1 %900 }
 0x2b5   : > { %v1938_v14 = vpop.eup %1937  ;;  %817 = vmatprep.subr.mxu1 %v2407_v11  ;;  %v2423_v58 = vadd.f32 %v1936_v12, %v2351_v63  ;;  %v1785_v63 = vld [vmem:[%s2663_s3 + $0x30] sm:$0xff] }
 0x2b6   : > { %818 = vmatpush1.msra.mxu1 %v2411_v13  ;;  %v2427_v59 = vadd.f32 %v1938_v14, %v2354_v0  ;;  %v1786_v0 = vld [vmem:[%s2663_s3 + $0x38] sm:$0xff] }
 0x2b7   : > { %819 = vmatprep.subr.mxu1 %v2415_v54 }
 0x2b8   : > { %820 = vmatpush1.msra.mxu1 %v2419_v56 }
 0x2b9   : > { %821 = vmatprep.subr.mxu1 %v2423_v58 }
 0x2ba   : > { %822 = vmatpush1.msra.mxu1 %v2427_v59 }
 0x2bb   : > { %1791 = vmatmul.mubr.msk.f32.vlgmr.msra.gmra.mxu1 %vm494_vm1, %v1783_v60 }
 0x2bc   : > { %861 = vmatprep.mubr.f32.mxu1 %v2097_v1 }
 0x2bf   : > { %1792 = vmatmul.mubr.msk.f32.gmra.mxu1 %vm494_vm1, %v1784_v62 }
 0x2c0   : > { %867 = vmatprep.mubr.f32.mxu1 %v2097_v1 }
 0x2c3   : > { %1793 = vmatmul.mubr.msk.f32.gmra.mxu1 %vm494_vm1, %v1785_v63 }
 0x2c4   : > { %873 = vmatprep.mubr.f32.mxu1 %v2097_v1 }
 0x2c7   : > { %1794 = vmatmul.mubr.msk.f32.gmra.mxu1 %vm494_vm1, %v1786_v0 }
 0x2c8   : > { %1141 = vmatprep.mubr.f32.mxu1 %v2097_v1 }
 0x37b   : > { %v857_v15 = vpop.f32.mrf.mxu1 }
 0x37c   : > { %v858_v34 = vadd.f32 %v857_v15, %v762_v31 }
 0x37d   : > { %v859_v16 = vpop.f32.mrf.mxu1 }
 0x37e   : > { %v860_v33 = vadd.f32 %v859_v16, %v762_v31  ;;  %v1058_v31 = vpop.permute.xlu1 %1057 }
 0x37f   : > { %v863_v17 = vpop.f32.mrf.mxu1 }
 0x380   : > { %v864_v32 = vadd.f32 %v863_v17, %v767_v28 }
 0x381   : > { %v865_v18 = vpop.f32.mrf.mxu1 }
 0x382   : > { %v866_v30 = vadd.f32 %v865_v18, %v767_v28 }
 0x383   : > { %v869_v19 = vpop.f32.mrf.mxu1 }
 0x384   : > { %v870_v29 = vadd.f32 %v869_v19, %v772_v22 }
 0x385   : > { %v871_v21 = vpop.f32.mrf.mxu1 }
 0x386   : > { %v872_v26 = vadd.f32 %v871_v21, %v772_v22 }
 0x387   : > { %v875_v23 = vpop.f32.mrf.mxu1 }
 0x388   : > { %v876_v24 = vadd.f32 %v875_v23, %v777_v20 }
 0x389   : > { %v877_v25 = vpop.f32.mrf.mxu1 }
 0x38a   : > { %v878_v27 = vadd.f32 %v877_v25, %v777_v20 }
 0x38c   : > { %1939 = vtanh.f32 %v878_v27 }
 0x38d   : > { %1941 = vtanh.f32 %v876_v24 }
 0x38e   : > { %1943 = vtanh.f32 %v872_v26 }
 0x38f   : > { %1945 = vtanh.f32 %v870_v29  ;;  %v1063_v29 = vpop.permute.xlu0 %1062 }
 0x390   : > { %1947 = vtanh.f32 %v866_v30 }
 0x391   : > { %1949 = vtanh.f32 %v864_v32 }
 0x392   : > { %1951 = vtanh.f32 %v860_v33 }
 0x393   : > { %1953 = vtanh.f32 %v858_v34 }
 0x399   : > { %v1940_v35 = vpop.eup %1939 }
 0x39a   : > { %v1942_v36 = vpop.eup %1941  ;;  %954 = vmatprep.subr.mxu0 %v1940_v35 }
 0x39b   : > { %v1944_v37 = vpop.eup %1943  ;;  %955 = vmatpush1.msra.mxu0 %v1942_v36 }
 0x39c   : > { %v1946_v38 = vpop.eup %1945  ;;  %956 = vmatprep.subr.mxu0 %v1944_v37  ;;  %v1053_v37 = vpop.permute.xlu0 %1052 }
 0x39d   : > { %v1948_v39 = vpop.eup %1947  ;;  %957 = vmatpush1.msra.mxu0 %v1946_v38 }
 0x39e   : > { %v1950_v40 = vpop.eup %1949  ;;  %958 = vmatprep.subr.mxu0 %v1948_v39 }
 0x39f   : > { %v1952_v41 = vpop.eup %1951  ;;  %959 = vmatpush1.msra.mxu0 %v1950_v40  ;;  %v1048_v40 = vpop.permute.xlu1 %1047 }
 0x3a0   : > { %v1954_v43 = vpop.eup %1953  ;;  %960 = vmatprep.subr.mxu0 %v1952_v41 }
 0x3a1   : > { %961 = vmatpush1.msra.mxu0 %v1954_v43 }
 0x3a2   : > { %1803 = vmatmul.mubr.msk.f32.vlgmr.msra.gmra.mxu0 %vm494_vm1, %v1795_v42 }
 0x3a3   : > { %1000 = vmatprep.mubr.f32.mxu0 %v2097_v1 }
 0x3a6   : > { %1804 = vmatmul.mubr.msk.f32.gmra.mxu0 %vm494_vm1, %v1796_v44 }
 0x3a7   : > { %1006 = vmatprep.mubr.f32.mxu0 %v2097_v1 }
 0x3aa   : > { %1805 = vmatmul.mubr.msk.f32.gmra.mxu0 %vm494_vm1, %v1797_v45 }
 0x3ab   : > { %1012 = vmatprep.mubr.f32.mxu0 %v2097_v1 }
 0x3ae   : > { %1806 = vmatmul.mubr.msk.f32.gmra.mxu0 %vm494_vm1, %v1798_v46 }
 0x3af   : > { %1280 = vmatprep.mubr.f32.mxu0 %v2097_v1 }
 0x462   : > { %v996_v47 = vpop.f32.mrf.mxu0 }
 0x463   : > { %v997_v60 = vadd.f32 %v996_v47, %v901_v10 }
 0x464   : > { %v998_v48 = vpop.f32.mrf.mxu0 }
 0x465   : > { %v999_v14 = vadd.f32 %v998_v48, %v901_v10 }
 0x466   : > { %v1002_v49 = vpop.f32.mrf.mxu0 }
 0x467   : > { %v1003_v12 = vadd.f32 %v1002_v49, %v906_v3 }
 0x468   : > { %v1004_v50 = vpop.f32.mrf.mxu0 }
 0x469   : > { %v1005_v6 = vadd.f32 %v1004_v50, %v906_v3 }
 0x46a   : > { %v1008_v52 = vpop.f32.mrf.mxu0 }
 0x46b   : > { %v1009_v4 = vadd.f32 %v1008_v52, %v911_v53 }
 0x46c   : > { %v1010_v55 = vpop.f32.mrf.mxu0 }
 0x46d   : > { %v1011_v57 = vadd.f32 %v1010_v55, %v911_v53  ;;  %v1820_v53 = vld [vmem:[%s2665_s5 + $0x48] sm:$0xff]  ;;  %v1821_v55 = vld [vmem:[%s2665_s5 + $0x50] sm:$0xff] }
 0x46e   : > { %v1014_v61 = vpop.f32.mrf.mxu0 }
 0x46f   : > { %v1015_v2 = vadd.f32 %v1014_v61, %v916_v51  ;;  %1955 = vtanh.f32 %v1011_v57  ;;  %v1822_v57 = vld [vmem:[%s2665_s5 + $0x58] sm:$0xff] }
 0x470   : > { %v1016_v5 = vpop.f32.mrf.mxu0 }
 0x471   : > { %v1017_v8 = vadd.f32 %v1016_v5, %v916_v51  ;;  %1957 = vtanh.f32 %v1015_v2  ;;  %v1819_v51 = vld [vmem:[%s2665_s5 + $0x40] sm:$0xff]  ;;  %v1202_v5 = vpop.permute.xlu0 %1201 }
 0x473   : > { %1959 = vtanh.f32 %v1017_v8  ;;  %v1197_v8 = vpop.permute.xlu1 %1196 }
 0x474   : > { %1961 = vtanh.f32 %v1009_v4 }
 0x475   : > { %1963 = vtanh.f32 %v1005_v6 }
 0x476   : > { %1965 = vtanh.f32 %v1003_v12 }
 0x477   : > { %1967 = vtanh.f32 %v999_v14 }
 0x478   : > { %1969 = vtanh.f32 %v997_v60 }
 0x47c   : > { %v1956_v62 = vpop.eup %1955 }
 0x47d   : > { %v2479_v20 = vadd.f32 %v1956_v62, %v2407_v11  ;;  %v1192_v62 = vpop.permute.xlu0 %1191 }
 0x47e   : > { %v1958_v63 = vpop.eup %1957 }
 0x47f   : > { %v2475_v18 = vadd.f32 %v1958_v63, %v2403_v9 }
 0x480   : > { %v1960_v0 = vpop.eup %1959 }
 0x481   : > { %v1962_v15 = vpop.eup %1961  ;;  %v2472_v16 = vadd.f32 %v1960_v0, %v2400_v7 }
 0x482   : > { %v1964_v17 = vpop.eup %1963  ;;  %v2483_v22 = vadd.f32 %v1962_v15, %v2411_v13 }
 0x483   : > { %v1966_v19 = vpop.eup %1965  ;;  %1101 = vmatprep.subr.mxu1 %v2472_v16  ;;  %v2487_v7 = vadd.f32 %v1964_v17, %v2415_v54  ;;  %v1807_v54 = vld [vmem:[%s2663_s3 + $0x40] sm:$0xff] }
 0x484   : > { %v1968_v21 = vpop.eup %1967  ;;  %1102 = vmatpush1.msra.mxu1 %v2475_v18  ;;  %v2491_v9 = vadd.f32 %v1966_v19, %v2419_v56  ;;  %v1808_v56 = vld [vmem:[%s2663_s3 + $0x48] sm:$0xff]  ;;  %v1187_v19 = vpop.permute.xlu1 %1186 }
 0x485   : > { %v1970_v23 = vpop.eup %1969  ;;  %1103 = vmatprep.subr.mxu1 %v2479_v20  ;;  %v2495_v11 = vadd.f32 %v1968_v21, %v2423_v58  ;;  %v1809_v58 = vld [vmem:[%s2663_s3 + $0x50] sm:$0xff] }
 0x486   : > { %1104 = vmatpush1.msra.mxu1 %v2483_v22  ;;  %v2499_v13 = vadd.f32 %v1970_v23, %v2427_v59  ;;  %v1810_v59 = vld [vmem:[%s2663_s3 + $0x58] sm:$0xff] }
 0x487   : > { %1105 = vmatprep.subr.mxu1 %v2487_v7 }
 0x488   : > { %1106 = vmatpush1.msra.mxu1 %v2491_v9 }
 0x489   : > { %1107 = vmatprep.subr.mxu1 %v2495_v11 }
 0x48a   : > { %1108 = vmatpush1.msra.mxu1 %v2499_v13 }
 0x48b   : > { %1815 = vmatmul.mubr.msk.f32.vlgmr.msra.gmra.mxu1 %vm494_vm1, %v1807_v54 }
 0x48c   : > { %1147 = vmatprep.mubr.f32.mxu1 %v2097_v1 }
 0x48f   : > { %1816 = vmatmul.mubr.msk.f32.gmra.mxu1 %vm494_vm1, %v1808_v56 }
 0x490   : > { %1153 = vmatprep.mubr.f32.mxu1 %v2097_v1 }
 0x493   : > { %1817 = vmatmul.mubr.msk.f32.gmra.mxu1 %vm494_vm1, %v1809_v58 }
 0x494   : > { %1159 = vmatprep.mubr.f32.mxu1 %v2097_v1 }
 0x497   : > { %1818 = vmatmul.mubr.msk.f32.gmra.mxu1 %vm494_vm1, %v1810_v59 }
 0x498   : > { %1427 = vmatprep.mubr.f32.mxu1 %v2097_v1 }
 0x54b   : > { %v1143_v24 = vpop.f32.mrf.mxu1 }
 0x54c   : > { %v1144_v43 = vadd.f32 %v1143_v24, %v1048_v40 }
 0x54d   : > { %v1145_v25 = vpop.f32.mrf.mxu1 }
 0x54e   : > { %v1146_v42 = vadd.f32 %v1145_v25, %v1048_v40  ;;  %v1344_v40 = vpop.permute.xlu1 %1343 }
 0x54f   : > { %v1149_v26 = vpop.f32.mrf.mxu1 }
 0x550   : > { %v1150_v41 = vadd.f32 %v1149_v26, %v1053_v37 }
 0x551   : > { %v1151_v27 = vpop.f32.mrf.mxu1 }
 0x552   : > { %v1152_v39 = vadd.f32 %v1151_v27, %v1053_v37 }
 0x553   : > { %v1155_v28 = vpop.f32.mrf.mxu1 }
 0x554   : > { %v1156_v38 = vadd.f32 %v1155_v28, %v1058_v31 }
 0x555   : > { %v1157_v30 = vpop.f32.mrf.mxu1 }
 0x556   : > { %v1158_v35 = vadd.f32 %v1157_v30, %v1058_v31 }
 0x557   : > { %v1161_v32 = vpop.f32.mrf.mxu1 }
 0x558   : > { %v1162_v33 = vadd.f32 %v1161_v32, %v1063_v29 }
 0x559   : > { %v1163_v34 = vpop.f32.mrf.mxu1 }
 0x55a   : > { %v1164_v36 = vadd.f32 %v1163_v34, %v1063_v29 }
 0x55c   : > { %1971 = vtanh.f32 %v1164_v36 }
 0x55d   : > { %1973 = vtanh.f32 %v1162_v33 }
 0x55e   : > { %1975 = vtanh.f32 %v1158_v35 }
 0x55f   : > { %1977 = vtanh.f32 %v1156_v38  ;;  %v1349_v38 = vpop.permute.xlu0 %1348 }
 0x560   : > { %1979 = vtanh.f32 %v1152_v39 }
 0x561   : > { %1981 = vtanh.f32 %v1150_v41 }
 0x562   : > { %1983 = vtanh.f32 %v1146_v42 }
 0x563   : > { %1985 = vtanh.f32 %v1144_v43 }
 0x569   : > { %v1972_v44 = vpop.eup %1971 }
 0x56a   : > { %v1974_v45 = vpop.eup %1973  ;;  %1240 = vmatprep.subr.mxu0 %v1972_v44 }
 0x56b   : > { %v1976_v46 = vpop.eup %1975  ;;  %1241 = vmatpush1.msra.mxu0 %v1974_v45 }
 0x56c   : > { %v1978_v47 = vpop.eup %1977  ;;  %1242 = vmatprep.subr.mxu0 %v1976_v46  ;;  %v1339_v46 = vpop.permute.xlu0 %1338 }
 0x56d   : > { %v1980_v48 = vpop.eup %1979  ;;  %1243 = vmatpush1.msra.mxu0 %v1978_v47 }
 0x56e   : > { %v1982_v49 = vpop.eup %1981  ;;  %1244 = vmatprep.subr.mxu0 %v1980_v48 }
 0x56f   : > { %v1984_v50 = vpop.eup %1983  ;;  %1245 = vmatpush1.msra.mxu0 %v1982_v49  ;;  %v1334_v49 = vpop.permute.xlu1 %1333 }
 0x570   : > { %v1986_v52 = vpop.eup %1985  ;;  %1246 = vmatprep.subr.mxu0 %v1984_v50 }
 0x571   : > { %1247 = vmatpush1.msra.mxu0 %v1986_v52 }
 0x572   : > { %1827 = vmatmul.mubr.msk.f32.vlgmr.msra.gmra.mxu0 %vm494_vm1, %v1819_v51 }
 0x573   : > { %1286 = vmatprep.mubr.f32.mxu0 %v2097_v1 }
 0x576   : > { %1828 = vmatmul.mubr.msk.f32.gmra.mxu0 %vm494_vm1, %v1820_v53 }
 0x577   : > { %1292 = vmatprep.mubr.f32.mxu0 %v2097_v1 }
 0x57a   : > { %1829 = vmatmul.mubr.msk.f32.gmra.mxu0 %vm494_vm1, %v1821_v55 }
 0x57b   : > { %1298 = vmatprep.mubr.f32.mxu0 %v2097_v1 }
 0x57e   : > { %1830 = vmatmul.mubr.msk.f32.gmra.mxu0 %vm494_vm1, %v1822_v57 }
 0x57f   : > { %1566 = vmatprep.mubr.f32.mxu0 %v2097_v1 }
 0x632   : > { %v1282_v61 = vpop.f32.mrf.mxu0 }
 0x633   : > { %v1283_v54 = vadd.f32 %v1282_v61, %v1187_v19 }
 0x634   : > { %v1284_v2 = vpop.f32.mrf.mxu0 }
 0x635   : > { %v1285_v23 = vadd.f32 %v1284_v2, %v1187_v19 }
 0x636   : > { %v1288_v3 = vpop.f32.mrf.mxu0 }
 0x637   : > { %v1289_v21 = vadd.f32 %v1288_v3, %v1192_v62 }
 0x638   : > { %v1290_v4 = vpop.f32.mrf.mxu0 }
 0x639   : > { %v1291_v15 = vadd.f32 %v1290_v4, %v1192_v62 }
 0x63a   : > { %v1294_v6 = vpop.f32.mrf.mxu0 }
 0x63b   : > { %v1295_v63 = vadd.f32 %v1294_v6, %v1197_v8 }
 0x63c   : > { %v1296_v10 = vpop.f32.mrf.mxu0 }
 0x63d   : > { %v1297_v12 = vadd.f32 %v1296_v10, %v1197_v8  ;;  %v1844_v8 = vld [vmem:[%s2665_s5 + $0x68] sm:$0xff]  ;;  %v1845_v10 = vld [vmem:[%s2665_s5 + $0x70] sm:$0xff] }
 0x63e   : > { %v1300_v14 = vpop.f32.mrf.mxu0 }
 0x63f   : > { %v1301_v60 = vadd.f32 %v1300_v14, %v1202_v5  ;;  %1987 = vtanh.f32 %v1297_v12  ;;  %v1846_v12 = vld [vmem:[%s2665_s5 + $0x78] sm:$0xff] }
 0x640   : > { %v1302_v0 = vpop.f32.mrf.mxu0 }
 0x641   : > { %v1303_v17 = vadd.f32 %v1302_v0, %v1202_v5  ;;  %1989 = vtanh.f32 %v1301_v60  ;;  %v1843_v5 = vld [vmem:[%s2665_s5 + $0x60] sm:$0xff]  ;;  %v1488_v0 = vpop.permute.xlu0 %1487 }
 0x643   : > { %1991 = vtanh.f32 %v1303_v17  ;;  %v1483_v17 = vpop.permute.xlu1 %1482 }
 0x644   : > { %1993 = vtanh.f32 %v1295_v63 }
 0x645   : > { %1995 = vtanh.f32 %v1291_v15 }
 0x646   : > { %1997 = vtanh.f32 %v1289_v21 }
 0x647   : > { %1999 = vtanh.f32 %v1285_v23 }
 0x648   : > { %2001 = vtanh.f32 %v1283_v54 }
 0x64c   : > { %v1988_v56 = vpop.eup %1987 }
 0x64d   : > { %v2551_v29 = vadd.f32 %v1988_v56, %v2479_v20  ;;  %v1478_v56 = vpop.permute.xlu0 %1477 }
 0x64e   : > { %v1990_v58 = vpop.eup %1989 }
 0x64f   : > { %v2547_v27 = vadd.f32 %v1990_v58, %v2475_v18 }
 0x650   : > { %v1992_v59 = vpop.eup %1991 }
 0x651   : > { %v1994_v24 = vpop.eup %1993  ;;  %v2544_v25 = vadd.f32 %v1992_v59, %v2472_v16 }
 0x652   : > { %v1996_v26 = vpop.eup %1995  ;;  %v2555_v31 = vadd.f32 %v1994_v24, %v2483_v22 }
 0x653   : > { %v1998_v28 = vpop.eup %1997  ;;  %1387 = vmatprep.subr.mxu1 %v2544_v25  ;;  %v2559_v16 = vadd.f32 %v1996_v26, %v2487_v7  ;;  %v1831_v7 = vld [vmem:[%s2663_s3 + $0x60] sm:$0xff]  ;;  %v1473_v26 = vpop.permute.xlu1 %1472 }
 0x654   : > { %v2000_v30 = vpop.eup %1999  ;;  %1388 = vmatpush1.msra.mxu1 %v2547_v27  ;;  %v2563_v18 = vadd.f32 %v1998_v28, %v2491_v9  ;;  %v1832_v9 = vld [vmem:[%s2663_s3 + $0x68] sm:$0xff] }
 0x655   : > { %v2002_v32 = vpop.eup %2001  ;;  %1389 = vmatprep.subr.mxu1 %v2551_v29  ;;  %v2567_v20 = vadd.f32 %v2000_v30, %v2495_v11  ;;  %v1833_v11 = vld [vmem:[%s2663_s3 + $0x70] sm:$0xff] }
 0x656   : > { %1390 = vmatpush1.msra.mxu1 %v2555_v31  ;;  %v2571_v22 = vadd.f32 %v2002_v32, %v2499_v13  ;;  %v1834_v13 = vld [vmem:[%s2663_s3 + $0x78] sm:$0xff] }
 0x657   : > { %1391 = vmatprep.subr.mxu1 %v2559_v16 }
 0x658   : > { %1392 = vmatpush1.msra.mxu1 %v2563_v18 }
 0x659   : > { %1393 = vmatprep.subr.mxu1 %v2567_v20 }
 0x65a   : > { %1394 = vmatpush1.msra.mxu1 %v2571_v22 }
 0x65b   : > { %1839 = vmatmul.mubr.msk.f32.vlgmr.msra.gmra.mxu1 %vm494_vm1, %v1831_v7 }
 0x65c   : > { %1433 = vmatprep.mubr.f32.mxu1 %v2097_v1 }
 0x65f   : > { %1840 = vmatmul.mubr.msk.f32.gmra.mxu1 %vm494_vm1, %v1832_v9 }
 0x660   : > { %1439 = vmatprep.mubr.f32.mxu1 %v2097_v1 }
 0x663   : > { %1841 = vmatmul.mubr.msk.f32.gmra.mxu1 %vm494_vm1, %v1833_v11 }
 0x664   : > { %1445 = vmatprep.mubr.f32.mxu1 %v2097_v1 }
 0x667   : > { %1842 = vmatmul.mubr.msk.f32.gmra.mxu1 %vm494_vm1, %v1834_v13 }
 0x668   : > { %1681 = vmatprep.mubr.f32.mxu1 %v2097_v1 }
 0x71b   : > { %v1429_v33 = vpop.f32.mrf.mxu1 }
 0x71c   : > { %v1430_v52 = vadd.f32 %v1429_v33, %v1334_v49 }
 0x71d   : > { %v1431_v34 = vpop.f32.mrf.mxu1 }
 0x71e   : > { %v1432_v51 = vadd.f32 %v1431_v34, %v1334_v49 }
 0x71f   : > { %v1435_v35 = vpop.f32.mrf.mxu1 }
 0x720   : > { %v1436_v50 = vadd.f32 %v1435_v35, %v1339_v46 }
 0x721   : > { %v1437_v36 = vpop.f32.mrf.mxu1 }
 0x722   : > { %v1438_v48 = vadd.f32 %v1437_v36, %v1339_v46 }
 0x723   : > { %v1441_v37 = vpop.f32.mrf.mxu1 }
 0x724   : > { %v1442_v47 = vadd.f32 %v1441_v37, %v1344_v40 }
 0x725   : > { %v1443_v39 = vpop.f32.mrf.mxu1 }
 0x726   : > { %v1444_v44 = vadd.f32 %v1443_v39, %v1344_v40 }
 0x727   : > { %v1447_v41 = vpop.f32.mrf.mxu1 }
 0x728   : > { %v1448_v42 = vadd.f32 %v1447_v41, %v1349_v38 }
 0x729   : > { %v1449_v43 = vpop.f32.mrf.mxu1 }
 0x72a   : > { %v1450_v45 = vadd.f32 %v1449_v43, %v1349_v38 }
 0x72c   : > { %2003 = vtanh.f32 %v1450_v45 }
 0x72d   : > { %2005 = vtanh.f32 %v1448_v42 }
 0x72e   : > { %2007 = vtanh.f32 %v1444_v44 }
 0x72f   : > { %2009 = vtanh.f32 %v1442_v47 }
 0x730   : > { %2011 = vtanh.f32 %v1438_v48 }
 0x731   : > { %2013 = vtanh.f32 %v1436_v50 }
 0x732   : > { %2015 = vtanh.f32 %v1432_v51 }
 0x733   : > { %2017 = vtanh.f32 %v1430_v52 }
 0x739   : > { %v2004_v53 = vpop.eup %2003 }
 0x73a   : > { %v2006_v55 = vpop.eup %2005  ;;  %1526 = vmatprep.subr.mxu0 %v2004_v53 }
 0x73b   : > { %v2008_v57 = vpop.eup %2007  ;;  %1527 = vmatpush1.msra.mxu0 %v2006_v55 }
 0x73c   : > { %v2010_v61 = vpop.eup %2009  ;;  %1528 = vmatprep.subr.mxu0 %v2008_v57 }
 0x73d   : > { %v2012_v2 = vpop.eup %2011  ;;  %1529 = vmatpush1.msra.mxu0 %v2010_v61 }
 0x73e   : > { %v2014_v3 = vpop.eup %2013  ;;  %1530 = vmatprep.subr.mxu0 %v2012_v2 }
 0x73f   : > { %v2016_v4 = vpop.eup %2015  ;;  %1531 = vmatpush1.msra.mxu0 %v2014_v3 }
 0x740   : > { %v2018_v6 = vpop.eup %2017  ;;  %1532 = vmatprep.subr.mxu0 %v2016_v4 }
 0x741   : > { %1533 = vmatpush1.msra.mxu0 %v2018_v6 }
 0x742   : > { %1851 = vmatmul.mubr.msk.f32.vlgmr.msra.gmra.mxu0 %vm494_vm1, %v1843_v5 }
 0x743   : > { %1572 = vmatprep.mubr.f32.mxu0 %v2097_v1 }
 0x746   : > { %1852 = vmatmul.mubr.msk.f32.gmra.mxu0 %vm494_vm1, %v1844_v8 }
 0x747   : > { %1578 = vmatprep.mubr.f32.mxu0 %v2097_v1 }
 0x74a   : > { %1853 = vmatmul.mubr.msk.f32.gmra.mxu0 %vm494_vm1, %v1845_v10 }
 0x74b   : > { %1584 = vmatprep.mubr.f32.mxu0 %v2097_v1 }
 0x74e   : > { %1854 = vmatmul.mubr.msk.f32.gmra.mxu0 %vm494_vm1, %v1846_v12 }
 0x802   : > { %v1568_v14 = vpop.f32.mrf.mxu0 }
 0x803   : > { %v1569_v32 = vadd.f32 %v1568_v14, %v1473_v26 }
 0x804   : > { %v1570_v60 = vpop.f32.mrf.mxu0 }
 0x805   : > { %v1571_v30 = vadd.f32 %v1570_v60, %v1473_v26 }
 0x806   : > { %v1574_v62 = vpop.f32.mrf.mxu0 }
 0x807   : > { %v1575_v28 = vadd.f32 %v1574_v62, %v1478_v56 }
 0x808   : > { %v1576_v63 = vpop.f32.mrf.mxu0 }
 0x809   : > { %v1577_v59 = vadd.f32 %v1576_v63, %v1478_v56 }
 0x80a   : > { %v1580_v15 = vpop.f32.mrf.mxu0 }
 0x80b   : > { %v1581_v58 = vadd.f32 %v1580_v15, %v1483_v17 }
 0x80c   : > { %v1582_v19 = vpop.f32.mrf.mxu0 }
 0x80d   : > { %v1583_v21 = vadd.f32 %v1582_v19, %v1483_v17 }
 0x80e   : > { %v1586_v23 = vpop.f32.mrf.mxu0 }
 0x80f   : > { %v1587_v54 = vadd.f32 %v1586_v23, %v1488_v0  ;;  %2019 = vtanh.f32 %v1583_v21 }
 0x810   : > { %v1588_v1 = vpop.f32.mrf.mxu0 }
 0x811   : > { %v1589_v24 = vadd.f32 %v1588_v1, %v1488_v0  ;;  %2021 = vtanh.f32 %v1587_v54 }
 0x813   : > { %2023 = vtanh.f32 %v1589_v24 }
 0x814   : > { %2025 = vtanh.f32 %v1581_v58 }
 0x815   : > { %2027 = vtanh.f32 %v1577_v59 }
 0x816   : > { %2029 = vtanh.f32 %v1575_v28 }
 0x817   : > { %2031 = vtanh.f32 %v1571_v30 }
 0x818   : > { %2033 = vtanh.f32 %v1569_v32 }
 0x81c   : > { %v2020_v7 = vpop.eup %2019 }
 0x81d   : > { %v1604_v37 = vadd.f32 %v2020_v7, %v2551_v29  ;;  %v1607_v29 = vld [vmem:[%s2667_s7] sm:$0xff] }
 0x81e   : > { %v2022_v9 = vpop.eup %2021 }
 0x81f   : > { %v1605_v35 = vadd.f32 %v2022_v9, %v2547_v27 }
 0x820   : > { %v2024_v11 = vpop.eup %2023 }
 0x821   : > { %v2026_v13 = vpop.eup %2025  ;;  %v1606_v33 = vadd.f32 %v2024_v11, %v2544_v25 }
 0x822   : > { %v2028_v34 = vpop.eup %2027  ;;  %v1603_v39 = vadd.f32 %v2026_v13, %v2555_v31  ;;  %v1612_v31 = vpop.permute.xlu0 %1611 }
 0x823   : > { %v2030_v36 = vpop.eup %2029  ;;  %1641 = vmatprep.subr.mxu1 %v1606_v33  ;;  %v1602_v41 = vadd.f32 %v2028_v34, %v2559_v16 }
 0x824   : > { %v2032_v38 = vpop.eup %2031  ;;  %1642 = vmatpush1.msra.mxu1 %v1605_v35  ;;  %v1601_v25 = vadd.f32 %v2030_v36, %v2563_v18 }
 0x825   : > { %v2034_v40 = vpop.eup %2033  ;;  %1643 = vmatprep.subr.mxu1 %v1604_v37  ;;  %v1600_v27 = vadd.f32 %v2032_v38, %v2567_v20 }
 0x826   : > { %1644 = vmatpush1.msra.mxu1 %v1603_v39  ;;  %v1599_v42 = vadd.f32 %v2034_v40, %v2571_v22 }
 0x827   : > { %1645 = vmatprep.subr.mxu1 %v1602_v41 }
 0x828   : > { %1646 = vmatpush1.msra.mxu1 %v1601_v25 }
 0x829   : > { %1647 = vmatprep.subr.mxu1 %v1600_v27 }
 0x82a   : > { %1648 = vmatpush1.msra.mxu1 %v1599_v42 }
 0x82b   : > { %1855 = vmatmul.mubr.msk.f32.vlgmr.msra.gmra.mxu1 %vm494_vm1, %v1607_v29 }
 0x8eb   : > { %v1683_v16 = vpop.f32.mrf.mxu1 }
 0x8ec   : > { %v1684_v18 = vadd.f32 %v1683_v16, %v1612_v31 }
 0x8ed   : > { %v1685_v20 = vpop.f32.mrf.mxu1 }
 0x8ee   : > { %1688 = vst [vmem:[%s326_s22] sm:$0xff] %v1684_v18  ;;  %v1686_v22 = vadd.f32 %v1685_v20, %v1612_v31 }
 0x8f0   : > { %1689 = vst [vmem:[%s326_s22 + $0x8] sm:$0xff] %v1686_v22 }
 0x8f1   : > { %2048 = shalt.err (!%p2045_p3)
}
 0x8f2   : > { %s2049_s16 = scalar_lea.hbm %s1703_s25, 256  ;;  %s2053_s22 = scalar_lea.hbm %s2669_s9, 512 }
 0x8f3   : > { %p2050_p4 = scmp.ne.s32.totalorder %s1703_s25, %s2049_s16  ;;  %p2054_p9 = scmp.lt.s32.totalorder %s1703_s25, %s2669_s9 }
 0x8f4   : > { %p2055_p10 = scmp.lt.s32.totalorder %s2053_s22, %s2049_s16 }
 0x8f5   : > { %p2051_p7 = pnand %p2050_p4, %p2188_p5 }
 0x8f6   : > { %p2056_p11 = por %p2055_p10, %p2054_p9 }
 0x8f7   : > { %p2052_p8 = pneg %p2051_p7 }
 0x8f9   : > { %p2057_p12 = pnand %p2056_p11, %p2052_p8 }
 0x8fb   : > { %2060 = shalt.err (!%p2057_p12)
}
 0x8fc   : > { %1864 = dma.vmem_to_hbm [thread:$0]  (%p2188_p5), %s1706_s23, 256, %s1703_s25, %s1691_s26  }
 0x8fd PF: > { %p1870_p13 = scmp.ge.s32.totalorder %s2095_s12, 2  ;;  %s1717_s27 = sand.u32 1, %s2083_s30  }
 0x8fe   : > { %s1718_s28 = scalar_lea.sflag [#allocation3], %s1717_s27 }
 0x8ff   : > { %p1867_p0 = pnand %p1870_p13, %p2192_p6 }
 0x901   : > { %p1868_p1 = pneg %p1867_p0 }
 0x903   : > { %2078 = dma.done.wait (%p1868_p1), %s1718_s28, 256  }
 0x904   : > { %2080 = vsyncadd (%p1868_p1), %s1718_s28, 4294967040  ;;  %p19_p2 = scmp.ge.s32.totalorder %s2175_s15, 4   ;;  %s2672_s30 = smov %s2087_s10 }
 0x905   : > { %s2673_s10 = smov %s2091_s11  ;;  %s2674_s11 = smov %s2186_s18 }
 0x906   : > { %s2675_s12 = smov %s2175_s15  ;;  %21 = sbr.rel (!%p19_p2) target bundleno = 3 (0x3), region = 103 }
 0x90b   :  { %1723 = vsyncpa [#allocation3], 1 }
 0x90c   :  { %1725 = vsyncpa [#allocation3 + $0x1], 1 }

</bundles_post_ra>
